<compile_context>
chip_gen: v5e
topology: v5e:2x2
jax: 0.10.0
libtpu: 0.0.40
codegen_flags: <defaults>
</compile_context>

<pallas_src>
import jax
import jax.numpy as jnp
from jax.experimental import pallas as pl
from jax.experimental.pallas import tpu as pltpu


def _round_up(x, m):
    return ((x + m - 1) // m) * m


def min_gru_kernel(h_ref, x_ref, w_ref, b_ref, out_ref, acc_ref):
    """One (batch tile, K tile) grid step of the fused minGRU cell.

    h_ref   : [tm, Hp]      previous hidden state tile (read only at last k)
    x_ref   : [tm, tk]      input tile (contraction slab)
    w_ref   : [tk, 2*Hp]    fused (W_i^T | W_h^T) weight slab
    b_ref   : [1, 2*Hp]     fused bias
    out_ref : [tm, Hp]      new hidden state tile
    acc_ref : [tm, 2*Hp]    f32 VMEM accumulator (resident across K steps)
    """
    k = pl.program_id(1)

    @pl.when(k == 0)
    def _():
        acc_ref[...] = jnp.zeros_like(acc_ref)

    # Single fused matmul on the MXU: produces [htilde_pre | z_pre].
    acc_ref[...] += jnp.dot(
        x_ref[...], w_ref[...], preferred_element_type=jnp.float32
    )

    @pl.when(k == pl.num_programs(1) - 1)
    def _():
        hp = out_ref.shape[1]
        acc = acc_ref[...] + b_ref[...].astype(jnp.float32)
        htilde = acc[:, :hp]
        # sigmoid lowers to EUP exp + reciprocal (separate VLIW slot from VPU/MXU).
        z = jax.nn.sigmoid(acc[:, hp:])
        h = h_ref[...].astype(jnp.float32)
        # lerp(h, htilde, z) = h + z * (htilde - h)
        out_ref[...] = (h + z * (htilde - h)).astype(out_ref.dtype)


def prepare_params(w_i, b_i, w_h, b_h, lane=128):
    """One-time parameter prep (NOT in the per-step hot path).

    PyTorch nn.Linear stores W as [out, in]; we transpose to [in, out], zero-pad
    the hidden dim to a multiple of `lane`, and concatenate the two gates along
    the output axis so the kernel does a single lane-dense matmul.
    """
    H = w_i.shape[0]
    Hp = _round_up(H, lane)

    wi_t = jnp.zeros((Hp, Hp), w_i.dtype).at[:H, :H].set(w_i.T)
    wh_t = jnp.zeros((Hp, Hp), w_h.dtype).at[:H, :H].set(w_h.T)
    w_cat = jnp.concatenate([wi_t, wh_t], axis=1)  # [Hp, 2*Hp]

    b_cat = jnp.zeros((1, 2 * Hp), b_i.dtype)
    b_cat = b_cat.at[0, :H].set(b_i).at[0, Hp:Hp + H].set(b_h)
    return w_cat, b_cat


def min_gru_cell(h, inputs, w_cat, b_cat):
    """h, inputs: [B, H].  w_cat: [Hp, 2*Hp], b_cat: [1, 2*Hp] from prepare_params."""
    B, H = h.shape
    Hp = w_cat.shape[0]
    N2 = 2 * Hp

    # Batch tile: multiple of 8 sublanes; 128 rows per tile once the batch is big.
    if B <= 128:
        Bp = _round_up(B, 8)
        tm = Bp
    else:
        Bp = _round_up(B, 128)
        tm = 128

    # Contraction tile over the (padded) hidden dim.
    if Hp % 512 == 0:
        tk = 512
    elif Hp % 256 == 0:
        tk = 256
    else:
        tk = 128

    # Zero-pad activations to the lane/sublane-dense layout (sliced off below).
    # In a real model, keep h / inputs in the padded layout end-to-end instead.
    if (Bp, Hp) != (B, H):
        h = jnp.pad(h, ((0, Bp - B), (0, Hp - H)))
        inputs = jnp.pad(inputs, ((0, Bp - B), (0, Hp - H)))

    grid = (Bp // tm, Hp // tk)

    out = pl.pallas_call(
        min_gru_kernel,
        out_shape=jax.ShapeDtypeStruct((Bp, Hp), h.dtype),
        grid_spec=pltpu.PrefetchScalarGridSpec(
            num_scalar_prefetch=0,
            grid=grid,
            in_specs=[
                pl.BlockSpec((tm, Hp), lambda i, k: (i, 0)),      # h (resident per i)
                pl.BlockSpec((tm, tk), lambda i, k: (i, k)),      # inputs K slab
                pl.BlockSpec((tk, N2), lambda i, k: (k, 0)),      # fused weight slab
                pl.BlockSpec((1, N2), lambda i, k: (0, 0)),       # fused bias
            ],
            out_specs=pl.BlockSpec((tm, Hp), lambda i, k: (i, 0)),
            scratch_shapes=[pltpu.VMEM((tm, N2), jnp.float32)],
        ),
        compiler_params=pltpu.CompilerParams(
            dimension_semantics=("parallel", "arbitrary"),
            vmem_limit_bytes=32 * 1024 * 1024,
        ),
    )(h, inputs, w_cat, b_cat)

    return out[:B, :H]


def reference(h, inputs, w_i, b_i, w_h, b_h):
    htilde = inputs @ w_i.T + b_i
    z = jax.nn.sigmoid(inputs @ w_h.T + b_h)
    return h + z * (htilde - h)


if __name__ == "__main__":
    B, H = 8, 32  # batch, hidden_features

    key = jax.random.PRNGKey(0)
    k_h, k_x, k_wi, k_bi, k_wh, k_bh = jax.random.split(key, 6)

    # Deterministic init (matches nn.Linear's uniform(-1/sqrt(H), 1/sqrt(H)) range).
    bound = 1.0 / (H ** 0.5)
    w_i = jax.random.uniform(k_wi, (H, H), jnp.float32, -bound, bound)
    b_i = jax.random.uniform(k_bi, (H,), jnp.float32, -bound, bound)
    w_h = jax.random.uniform(k_wh, (H, H), jnp.float32, -bound, bound)
    b_h = jax.random.uniform(k_bh, (H,), jnp.float32, -bound, bound)

    h = jax.random.normal(k_h, (B, H), jnp.float32)
    inputs = jax.random.normal(k_x, (B, H), jnp.float32)

    # One-time parameter preparation (fused + transposed + lane-padded weights).
    w_cat, b_cat = prepare_params(w_i, b_i, w_h, b_h)

    out = min_gru_cell(h, inputs, w_cat, b_cat)
    out = jax.block_until_ready(out)

    ref = reference(h, inputs, w_i, b_i, w_h, b_h)
    assert out.shape == (B, H)
    assert jnp.allclose(out, ref, atol=1e-5, rtol=1e-5), "mismatch vs reference"

    print("KERNEL_OK")
</pallas_src>

<mosaic_0001>
module attributes {stable_mosaic.version = 11 : i64} {
  func.func @min_gru_kernel(%arg0: i32, %arg1: i32, %arg2: memref<8x128xf32, #tpu.memory_space<vmem>>, %arg3: memref<8x128xf32, #tpu.memory_space<vmem>>, %arg4: memref<128x256xf32, #tpu.memory_space<vmem>>, %arg5: memref<1x256xf32, #tpu.memory_space<vmem>>, %arg6: memref<8x128xf32, #tpu.memory_space<vmem>>, %arg7: memref<8x256xf32, #tpu.memory_space<vmem>>) attributes {dimension_semantics = [#tpu.dimension_semantics<parallel>, #tpu.dimension_semantics<arbitrary>], iteration_bounds = array<i64: 1, 1>, scalar_prefetch = 0 : i64, scratch_operands = 1 : i64, tpu.core_type = #tpu.core_type<tc>, window_params = [{transform_indices = @transform_0, window_bounds = array<i64: 8, 128>}, {transform_indices = @transform_1, window_bounds = array<i64: 8, 128>}, {transform_indices = @transform_2, window_bounds = array<i64: 128, 256>}, {pipeline_mode = #tpu.pipeline_mode<synchronous>, transform_indices = @transform_3, window_bounds = array<i64: 1, 256>}, {transform_indices = @transform_4, window_bounds = array<i64: 8, 128>}]} {
    %c0_i32 = arith.constant 0 : i32
    %0 = arith.cmpi eq, %arg1, %c0_i32 : i32
    %1 = arith.extui %0 : i1 to i32
    %c0_i32_0 = arith.constant 0 : i32
    %2 = arith.cmpi ne, %1, %c0_i32_0 : i32
    scf.if %2 {
      %cst_10 = arith.constant 0.000000e+00 : f32
      %12 = vector.broadcast %cst_10 : f32 to vector<8x256xf32>
      %c0_11 = arith.constant 0 : index
      %c0_12 = arith.constant 0 : index
      %13 = vector.load %arg7[%c0_11, %c0_12] : memref<8x256xf32, #tpu.memory_space<vmem>>, vector<8x256xf32>
      tpu.vector_store %arg7[%c0_11, %c0_12], %12 {strides = array<i32>} : memref<8x256xf32, #tpu.memory_space<vmem>>, vector<8x256xf32>,
    } else {
    }
    %c0 = arith.constant 0 : index
    %c0_1 = arith.constant 0 : index
    %3 = vector.load %arg7[%c0, %c0_1] : memref<8x256xf32, #tpu.memory_space<vmem>>, vector<8x256xf32>
    %c0_2 = arith.constant 0 : index
    %c0_3 = arith.constant 0 : index
    %4 = vector.load %arg3[%c0_2, %c0_3] : memref<8x128xf32, #tpu.memory_space<vmem>>, vector<8x128xf32>
    %c0_4 = arith.constant 0 : index
    %c0_5 = arith.constant 0 : index
    %5 = vector.load %arg4[%c0_4, %c0_5] : memref<128x256xf32, #tpu.memory_space<vmem>>, vector<128x256xf32>
    %cst = arith.constant dense<0.000000e+00> : vector<8x256xf32>
    %6 = tpu.matmul %4, %5, %cst {dimension_numbers = #tpu.dot_dimension_numbers<[1], [0], [0], [1], [0, 0, 1, 1], [], []>} : vector<8x128xf32>, vector<128x256xf32>, vector<8x256xf32> -> vector<8x256xf32>
    %7 = arith.addf %3, %6 : vector<8x256xf32>
    %c0_6 = arith.constant 0 : index
    %c0_7 = arith.constant 0 : index
    %8 = vector.load %arg7[%c0_6, %c0_7] : memref<8x256xf32, #tpu.memory_space<vmem>>, vector<8x256xf32>
    tpu.vector_store %arg7[%c0_6, %c0_7], %7 {strides = array<i32>} : memref<8x256xf32, #tpu.memory_space<vmem>>, vector<8x256xf32>,
    %c0_i32_8 = arith.constant 0 : i32
    %9 = arith.cmpi eq, %arg1, %c0_i32_8 : i32
    %10 = arith.extui %9 : i1 to i32
    %c0_i32_9 = arith.constant 0 : i32
    %11 = arith.cmpi ne, %10, %c0_i32_9 : i32
    scf.if %11 {
      %c0_10 = arith.constant 0 : index
      %c0_11 = arith.constant 0 : index
      %12 = vector.load %arg7[%c0_10, %c0_11] : memref<8x256xf32, #tpu.memory_space<vmem>>, vector<8x256xf32>
      %c0_12 = arith.constant 0 : index
      %c0_13 = arith.constant 0 : index
      %13 = vector.load %arg5[%c0_12, %c0_13] : memref<1x256xf32, #tpu.memory_space<vmem>>, vector<1x256xf32>
      %14 = vector.broadcast %13 : vector<1x256xf32> to vector<8x256xf32>
      %15 = arith.addf %12, %14 : vector<8x256xf32>
      %16 = vector.extract_strided_slice %15 {offsets = [0, 0], sizes = [8, 128], strides = [1, 1]} : vector<8x256xf32> to vector<8x128xf32>
      %17 = vector.extract_strided_slice %15 {offsets = [0, 128], sizes = [8, 128], strides = [1, 1]} : vector<8x256xf32> to vector<8x128xf32>
      %18 = arith.negf %17 : vector<8x128xf32>
      %19 = math.exp %18 : vector<8x128xf32>
      %cst_14 = arith.constant 1.000000e+00 : f32
      %20 = vector.broadcast %cst_14 : f32 to vector<8x128xf32>
      %21 = arith.addf %20, %19 : vector<8x128xf32>
      %22 = arith.divf %20, %21 : vector<8x128xf32>
      %c0_15 = arith.constant 0 : index
      %c0_16 = arith.constant 0 : index
      %23 = vector.load %arg2[%c0_15, %c0_16] : memref<8x128xf32, #tpu.memory_space<vmem>>, vector<8x128xf32>
      %24 = arith.subf %16, %23 : vector<8x128xf32>
      %25 = arith.mulf %22, %24 : vector<8x128xf32>
      %26 = arith.addf %23, %25 : vector<8x128xf32>
      %c0_17 = arith.constant 0 : index
      %c0_18 = arith.constant 0 : index
      %27 = vector.load %arg6[%c0_17, %c0_18] : memref<8x128xf32, #tpu.memory_space<vmem>>, vector<8x128xf32>
      tpu.vector_store %arg6[%c0_17, %c0_18], %26 {strides = array<i32>} : memref<8x128xf32, #tpu.memory_space<vmem>>, vector<8x128xf32>,
    } else {
    }
    return
  }
  func.func @transform_0(%arg0: i32, %arg1: i32) -> (i32, i32) {
    %c0_i32 = arith.constant 0 : i32
    %c0_i32_0 = arith.constant 0 : i32
    return %arg0, %c0_i32 : i32, i32
  }
  func.func @transform_1(%arg0: i32, %arg1: i32) -> (i32, i32) {
    %c0_i32 = arith.constant 0 : i32
    return %arg0, %arg1 : i32, i32
  }
  func.func @transform_2(%arg0: i32, %arg1: i32) -> (i32, i32) {
    %c0_i32 = arith.constant 0 : i32
    %c0_i32_0 = arith.constant 0 : i32
    return %arg1, %c0_i32 : i32, i32
  }
  func.func @transform_3(%arg0: i32, %arg1: i32) -> (i32, i32) {
    %c0_i32 = arith.constant 0 : i32
    %c0_i32_0 = arith.constant 0 : i32
    %c0_i32_1 = arith.constant 0 : i32
    return %c0_i32, %c0_i32_0 : i32, i32
  }
  func.func @transform_4(%arg0: i32, %arg1: i32) -> (i32, i32) {
    %c0_i32 = arith.constant 0 : i32
    %c0_i32_0 = arith.constant 0 : i32
    return %arg0, %c0_i32 : i32, i32
  }
}

</mosaic_0001>

<bundles_post_ra>
// kernel: tpu_custom_call.1
= control target key start
LH: loop header
LB: loop body
LE: loop exit
PB: predicated region body
PF: predicated region fallthrough
CT: control target
= control target key end

     0   :  { %9 = vsyncpa [#allocation4], 0  ;;  %s360_s0 = inlined_call_operand.hbm [shape: f32[8,128], index: 0, kind: input, shape index: {}]   ;;  %s361_s1 = inlined_call_operand.hbm [shape: f32[8,128], index: 1, kind: input, shape index: {}]   ;;  %s362_s2 = inlined_call_operand.hbm [shape: f32[128,256], index: 2, kind: input, shape index: {}]   ;;  %s363_s3 = inlined_call_operand.vmem [shape: f32[1,256], index: 3, kind: input, shape index: {}]   ;;  %s364_s4 = inlined_call_operand.hbm [shape: f32[8,128], index: 4, kind: output, shape index: {}]  }
   0x1   :  { %10 = vsyncpa [#allocation7], 0  ;;  %s28_s17 = sshll.u32 %s361_s1, 4  ;;  %s29_s17 = int_to_ptr.hbm [resolvable:$true] %s28_s17 }
   0x2   :  { %11 = vsyncpa [#allocation5], 0  ;;  %s314_s18 = smov [#allocation6]   ;;  %s17_s22 = sshll.u32 %s360_s0, 4  ;;  %s18_s22 = int_to_ptr.hbm [resolvable:$true] %s17_s22 }
   0x3   :  { %s30_s19 = sshll.u32 %s314_s18, 4  ;;  %s315_s23 = smov [#allocation3]   ;;  %s31_s19 = int_to_ptr.vmem [resolvable:$true] %s30_s19 }
   0x4   :  { %33 = dma.hbm_to_vmem [thread:$0]  %s29_s17, 128, %s31_s19, [#allocation7]  }
   0x5   :  { %s19_s24 = sshll.u32 %s315_s23, 4  ;;  %s38_s27 = sshll.u32 %s362_s2, 4  ;;  %s20_s24 = int_to_ptr.vmem [resolvable:$true] %s19_s24  ;;  %s39_s27 = int_to_ptr.hbm [resolvable:$true] %s38_s27 }
   0x6   :  { %22 = dma.hbm_to_vmem [thread:$0]  %s18_s22, 128, %s20_s24, [#allocation4]  }
   0x7   :  { %s316_s1 = smov [#allocation8]   ;;  %s317_s29 = smov 256  }
   0x8   :  { %s40_s28 = sshll.u32 %s316_s1, 4  ;;  %s318_s30 = smov 16   ;;  %s41_s28 = int_to_ptr.vmem [resolvable:$true] %s40_s28 }
   0x9   :  { %46 = dma.hbm_to_vmem [thread:$0]  %s39_s27, 4096, %s41_s28, [#allocation7], %s317_s29, %s317_s29, %s318_s30  }
   0xa   :  { %308 = dma.done.wait [#allocation4], 128  }
   0xb   :  { %309 = vsyncadd [#allocation4], 4294967168 }
   0xc   :  { %310 = dma.done.wait [#allocation7], 4224  }
   0xd   :  { %311 = vsyncadd [#allocation7], 4294963072  ;;  %v101_v0 = vld [vmem:[#allocation8 + $0xf8] sm:$0xff]  ;;  %v99_v1 = vld [vmem:[#allocation8 + $0xe8] sm:$0xff]  ;;  %s190_s8 = sshll.u32 %s364_s4, 4  ;;  %s191_s8 = int_to_ptr.hbm [resolvable:$true] %s190_s8 }
   0xe   :  { %122 = vmatpush.msra.mxu1 %v101_v0  ;;  %v97_v2 = vld [vmem:[#allocation8 + $0xd8] sm:$0xff]  ;;  %v95_v3 = vld [vmem:[#allocation8 + $0xc8] sm:$0xff]  ;;  %v100_v4 = vld [vmem:[#allocation8 + $0xf0] sm:$0xff] }
   0xf   :  { %102 = vmatpush.msra.mxu0 %v100_v4  ;;  %v98_v5 = vld [vmem:[#allocation8 + $0xe0] sm:$0xff]  ;;  %v93_v6 = vld [vmem:[#allocation8 + $0xb8] sm:$0xff]  ;;  %v96_v7 = vld [vmem:[#allocation8 + $0xd0] sm:$0xff] }
  0x10   :  { %123 = vmatpush.msra.mxu1 %v99_v1  ;;  %v91_v8 = vld [vmem:[#allocation8 + $0xa8] sm:$0xff]  ;;  %v94_v9 = vld [vmem:[#allocation8 + $0xc0] sm:$0xff]  ;;  %v89_v10 = vld [vmem:[#allocation8 + $0x98] sm:$0xff] }
  0x11   :  { %103 = vmatpush.msra.mxu0 %v98_v5  ;;  %v92_v11 = vld [vmem:[#allocation8 + $0xb0] sm:$0xff]  ;;  %v87_v12 = vld [vmem:[#allocation8 + $0x88] sm:$0xff]  ;;  %v90_v13 = vld [vmem:[#allocation8 + $0xa0] sm:$0xff] }
  0x12   :  { %124 = vmatpush.msra.mxu1 %v97_v2  ;;  %v85_v14 = vld [vmem:[#allocation8 + $0x78] sm:$0xff]  ;;  %v88_v15 = vld [vmem:[#allocation8 + $0x90] sm:$0xff]  ;;  %v83_v16 = vld [vmem:[#allocation8 + $0x68] sm:$0xff] }
  0x13   :  { %104 = vmatpush.msra.mxu0 %v96_v7  ;;  %v86_v17 = vld [vmem:[#allocation8 + $0x80] sm:$0xff]  ;;  %v81_v18 = vld [vmem:[#allocation8 + $0x58] sm:$0xff]  ;;  %v84_v19 = vld [vmem:[#allocation8 + $0x70] sm:$0xff] }
  0x14   :  { %125 = vmatpush.msra.mxu1 %v95_v3  ;;  %v79_v20 = vld [vmem:[#allocation8 + $0x48] sm:$0xff]  ;;  %v82_v21 = vld [vmem:[#allocation8 + $0x60] sm:$0xff]  ;;  %v77_v22 = vld [vmem:[#allocation8 + $0x38] sm:$0xff] }
  0x15   :  { %105 = vmatpush.msra.mxu0 %v94_v9  ;;  %v80_v23 = vld [vmem:[#allocation8 + $0x50] sm:$0xff]  ;;  %v75_v24 = vld [vmem:[#allocation8 + $0x28] sm:$0xff]  ;;  %v78_v25 = vld [vmem:[#allocation8 + $0x40] sm:$0xff] }
  0x16   :  { %126 = vmatpush.msra.mxu1 %v93_v6  ;;  %v73_v26 = vld [vmem:[#allocation8 + $0x18] sm:$0xff]  ;;  %v76_v27 = vld [vmem:[#allocation8 + $0x30] sm:$0xff]  ;;  %v71_v28 = vld [vmem:[#allocation8 + $0x8] sm:$0xff] }
  0x17   :  { %106 = vmatpush.msra.mxu0 %v92_v11  ;;  %v74_v29 = vld [vmem:[#allocation8 + $0x20] sm:$0xff]  ;;  %v69_v30 = vld [vmem:[#allocation6] sm:$0xff]  ;;  %v72_v31 = vld [vmem:[#allocation8 + $0x10] sm:$0xff] }
  0x18   :  { %127 = vmatpush.msra.mxu1 %v91_v8  ;;  %v70_v32 = vld [vmem:[#allocation8] sm:$0xff]  ;;  %v151_v33 = vld [vmem:[%s363_s3] sm:$0x3]  ;;  %s319_s3 = smov [#allocation9]  }
  0x19   :  { %107 = vmatpush.msra.mxu0 %v90_v13  ;;  %v154_v34 = vperm.slane %v151_v33, 1  ;;  %v153_v40 = vperm.slane %v151_v33, 0  ;;  %v178_v47 = vld [vmem:[#allocation3] sm:$0xff]  ;;  %s188_s5 = sshll.u32 %s319_s3, 4  ;;  %s189_s5 = int_to_ptr.vmem [resolvable:$true] %s188_s5 }
  0x1a   :  { %128 = vmatpush.msra.mxu1 %v89_v10 }
  0x1b   :  { %108 = vmatpush.msra.mxu0 %v88_v15 }
  0x1c   :  { %129 = vmatpush.msra.mxu1 %v87_v12 }
  0x1d   :  { %109 = vmatpush.msra.mxu0 %v86_v17 }
  0x1e   :  { %130 = vmatpush.msra.mxu1 %v85_v14 }
  0x1f   :  { %110 = vmatpush.msra.mxu0 %v84_v19 }
  0x20   :  { %131 = vmatpush.msra.mxu1 %v83_v16 }
  0x21   :  { %111 = vmatpush.msra.mxu0 %v82_v21 }
  0x22   :  { %132 = vmatpush.msra.mxu1 %v81_v18 }
  0x23   :  { %112 = vmatpush.msra.mxu0 %v80_v23 }
  0x24   :  { %133 = vmatpush.msra.mxu1 %v79_v20 }
  0x25   :  { %113 = vmatpush.msra.mxu0 %v78_v25 }
  0x26   :  { %134 = vmatpush.msra.mxu1 %v77_v22 }
  0x27   :  { %114 = vmatpush.msra.mxu0 %v76_v27 }
  0x28   :  { %135 = vmatpush.msra.mxu1 %v75_v24 }
  0x29   :  { %115 = vmatpush.msra.mxu0 %v74_v29 }
  0x2a   :  { %136 = vmatpush.msra.mxu1 %v73_v26 }
  0x2b   :  { %116 = vmatpush.msra.mxu0 %v72_v31 }
  0x2c   :  { %137 = vmatpush.msra.mxu1 %v71_v28 }
  0x2d   :  { %138 = vmatmul.f32.vlgmr.msra.gmra.mxu1 %v69_v30  ;;  %117 = vmatpush.msra.mxu0 %v70_v32 }
  0x2e   :  { %118 = vmatmul.f32.vlgmr.msra.gmra.mxu0 %v69_v30 }
  0xaa   :  { %v139_v35 = vpop.f32.mrf.mxu1 }
  0xab   :  { %v158_v36 = vadd.f32 %v154_v34, %v139_v35  ;;  %v119_v42 = vpop.f32.mrf.mxu0 }
  0xac   :  { %v157_v44 = vadd.f32 %v153_v40, %v119_v42 }
  0xad   :  { %v201_v37 = vmul.f32 -1.442695, %v158_v36 }
  0xae   :  { %v179_v51 = vsub.f32 %v157_v44, %v178_v47 }
  0xaf   :  { %208 = vpow2.f32 %v201_v37 }
  0xb5   :  { %v209_v38 = vpop.eup %208 }
  0xb6   :  { %v162_v39 = vadd.f32 1.0, %v209_v38 }
  0xb8   :  { %210 = vrcp.f32 %v162_v39  ;;  %v174_v46 = vand.u32 2147483648, %v162_v39  ;;  %v172_v49 = vand.u32 2147483647, %v162_v39  ;;  %vm168_vm1 = vweird.f32 %v162_v39 }
  0xba   :  { %v175_v52 = vor.u32 1.1754944e-38, %v174_v46  ;;  %vm173_vm3 = vcmp.eq.f32.partialorder %v172_v49, 8.507059e+37 }
  0xbe   :  { %v211_v41 = vpop.eup %210 }
  0xbf   :  { %v164_v43 = vmul.f32 %v211_v41, %v162_v39  ;;  %vm169_vm0 = vweird.f32 %v211_v41 }
  0xc0   :  { %vm170_vm2 = vmor %vm168_vm1, %vm169_vm0 }
  0xc1   :  { %v165_v45 = vsub.f32 1.0, %v164_v43 }
  0xc3   :  { %v166_v48 = vmul.f32 %v211_v41, %v165_v45 }
  0xc5   :  { %v167_v50 = vadd.f32 %v211_v41, %v166_v48 }
  0xc7   :  { %v171_v53 = vsel %vm170_vm2, %v211_v41, %v167_v50 }
  0xc8   :  { %v176_v54 = vsel %vm173_vm3, %v175_v52, %v171_v53 }
  0xc9   :  { %v180_v55 = vmul.f32 %v179_v51, %v176_v54 }
  0xcb   :  { %v181_v56 = vadd.f32 %v180_v55, %v178_v47 }
  0xcd   :  { %182 = vst [vmem:[#allocation9] sm:$0xff] %v181_v56 }
  0xce   :  { %193 = dma.vmem_to_hbm [thread:$0]  %s189_s5, 128, %s191_s8, [#allocation5]  }
  0xcf   :  { %312 = dma.done.wait [#allocation5], 128  }
  0xd0   :  { %313 = vsyncadd [#allocation5], 4294967168 }
  0xd1   :  { %198 = vsyncpa [#allocation4], 1 }
  0xd2   :  { %199 = vsyncpa [#allocation7], 1 }
  0xd3   :  { %200 = vsyncpa [#allocation5], 1 }

</bundles_post_ra>
